<compile_context>
chip_gen: v7x
topology: tpu7x:2x2x1
jax: 0.10.0
libtpu: 0.0.40
codegen_flags: <defaults>
</compile_context>

<pallas_src>
import jax
import jax.numpy as jnp
from jax.experimental import pallas as pl
from jax.experimental.pallas import tpu as pltpu


def _round_up(x, m):
    return (x + m - 1) // m * m


def _cdiv(a, b):
    return (a + b - 1) // b


# -----------------------------------------------------------------------------
# Kernel: one batch tile does the whole MLP (3 MXU matmuls + 2 ReLUs).
# -----------------------------------------------------------------------------
def _actor_critic_kernel(x_ref, w1_ref, b1_ref, w2_ref, b2_ref,
                         wh_ref, bh_ref, out_ref):
    # x_ref:  [TB, D_in]          bf16   (streamed per grid step)
    # w*_ref: [in, out]           bf16   (VMEM-resident across grid steps)
    # b*_ref: [1, out]            f32
    # out_ref:[TB, h_pad(128k)]   bf16   (lane-dense store)
    x = x_ref[...]

    h1 = jnp.dot(x, w1_ref[...], preferred_element_type=jnp.float32)
    h1 = jnp.maximum(h1 + b1_ref[...], 0.0)

    h2 = jnp.dot(h1.astype(w2_ref.dtype), w2_ref[...],
                 preferred_element_type=jnp.float32)
    h2 = jnp.maximum(h2 + b2_ref[...], 0.0)

    head = jnp.dot(h2.astype(wh_ref.dtype), wh_ref[...],
                   preferred_element_type=jnp.float32) + bh_ref[...]
    out_ref[...] = head.astype(out_ref.dtype)


# -----------------------------------------------------------------------------
# One-time parameter packing (hoisted out of the per-call wrapper).
# -----------------------------------------------------------------------------
def prepare_params(params):
    """Fuse pi/v head, zero-pad hidden dims to 128 lanes, cast dtypes. Do ONCE."""
    input_dims, fc1 = params["w1"].shape
    fc2 = params["w2"].shape[1]
    n_actions = params["w_pi"].shape[1]
    n_head = n_actions + 1

    fc1_p = _round_up(fc1, 128)
    fc2_p = _round_up(fc2, 128)
    h_pad = _round_up(n_head, 128)

    # Zero padding is exact: padded bias lanes -> relu(0)=0 activations, and the
    # corresponding padded weight rows of the next layer are 0, contributing 0.
    w1 = jnp.pad(params["w1"], ((0, 0), (0, fc1_p - fc1))).astype(jnp.bfloat16)
    b1 = jnp.pad(params["b1"], ((0, 0), (0, fc1_p - fc1))).astype(jnp.float32)
    w2 = jnp.pad(params["w2"],
                 ((0, fc1_p - fc1), (0, fc2_p - fc2))).astype(jnp.bfloat16)
    b2 = jnp.pad(params["b2"], ((0, 0), (0, fc2_p - fc2))).astype(jnp.float32)

    w_head = jnp.concatenate([params["w_pi"], params["w_v"]], axis=1)
    w_head = jnp.pad(w_head,
                     ((0, fc2_p - fc2), (0, h_pad - n_head))).astype(jnp.bfloat16)
    b_head = jnp.concatenate([params["b_pi"], params["b_v"]], axis=1)
    b_head = jnp.pad(b_head, ((0, 0), (0, h_pad - n_head))).astype(jnp.float32)

    packed = {"w1": w1, "b1": b1, "w2": w2, "b2": b2,
              "w_head": w_head, "b_head": b_head}
    dims = {"input_dims": int(input_dims), "fc1_p": int(fc1_p),
            "fc2_p": int(fc2_p), "n_actions": int(n_actions),
            "h_pad": int(h_pad)}
    return packed, dims


# -----------------------------------------------------------------------------
# Generation-aware batch-tile / VMEM-budget selection.
# -----------------------------------------------------------------------------
def _tile_and_vmem(padded_b, input_dims, fc1_p, fc2_p, h_pad):
    try:
        vmem_cap = int(pltpu.get_tpu_info().vmem_capacity_bytes)
    except Exception:
        vmem_cap = 0

    if vmem_cap >= 96 * 1024 * 1024:        # v5e / v6e: 128 MiB VMEM
        budget, tb_cap = 64 * 1024 * 1024, 2048
    elif vmem_cap > 0:                       # v7x: 64 MiB VMEM per TensorCore
        budget, tb_cap = 40 * 1024 * 1024, 1024
    else:                                    # unknown backend: be conservative
        budget, tb_cap = 32 * 1024 * 1024, 512

    # Resident weight/bias footprint (assume default double-buffering) + slack.
    resident = (2 * 2 * (input_dims * fc1_p + fc1_p * fc2_p + fc2_p * h_pad)
                + 2 * 4 * (fc1_p + fc2_p + h_pad))
    # Per-batch-row bytes: double-buffered bf16 obs/out tiles + f32 temporaries.
    per_row = (2 * 2 * input_dims + 2 * 2 * h_pad
               + 4 * (fc1_p + fc2_p + h_pad))
    avail = budget - resident - 2 * 1024 * 1024
    tb_fit = max(8, (avail // per_row) // 8 * 8)
    tb_cap = min(tb_cap, tb_fit)

    # Balanced tiles (minimal padding waste); >=2 tiles when the batch allows
    # it so "parallel" can shard across v7x's two TensorCores.
    min_tiles = 2 if padded_b >= 16 else 1
    n_tiles = max(min_tiles, _cdiv(padded_b, tb_cap))
    tb = _round_up(_cdiv(padded_b, n_tiles), 8)
    return tb, budget


# -----------------------------------------------------------------------------
# Forward wrapper.
# -----------------------------------------------------------------------------
def actor_critic_forward(obs, packed, dims):
    """obs: [B, input_dims] f32.  Returns (pi [B, n_actions] f32, v [B, 1] f32)."""
    batch = obs.shape[0]
    input_dims = dims["input_dims"]
    fc1_p, fc2_p = dims["fc1_p"], dims["fc2_p"]
    n_actions, h_pad = dims["n_actions"], dims["h_pad"]

    padded_b = _round_up(max(batch, 8), 8)
    tb, vmem_budget = _tile_and_vmem(padded_b, input_dims, fc1_p, fc2_p, h_pad)
    grid = (_cdiv(padded_b, tb),)
    total_rows = grid[0] * tb

    obs_bf16 = obs.astype(jnp.bfloat16)
    if total_rows != batch:
        obs_bf16 = jnp.pad(obs_bf16, ((0, total_rows - batch), (0, 0)))

    weight_elems = input_dims * fc1_p + fc1_p * fc2_p + fc2_p * h_pad
    cost = pl.CostEstimate(
        flops=2 * total_rows * weight_elems,
        transcendentals=0,
        bytes_accessed=(total_rows * input_dims * 2      # obs read (bf16)
                        + total_rows * h_pad * 2         # out write (bf16)
                        + weight_elems * 2               # weights (bf16)
                        + (fc1_p + fc2_p + h_pad) * 4),  # biases (f32)
    )

    def call(single_buffer_weights):
        def resident(shape):
            # Constant index_map -> block is VMEM-resident across all grid
            # steps; single-buffer it (never re-fetched) when supported.
            if single_buffer_weights:
                return pl.BlockSpec(shape, lambda i: (0, 0),
                                    pipeline_mode=pl.Buffered(1))
            return pl.BlockSpec(shape, lambda i: (0, 0))

        return pl.pallas_call(
            _actor_critic_kernel,
            out_shape=jax.ShapeDtypeStruct((total_rows, h_pad), jnp.bfloat16),
            grid_spec=pltpu.PrefetchScalarGridSpec(
                num_scalar_prefetch=0,
                grid=grid,
                in_specs=[
                    pl.BlockSpec((tb, input_dims), lambda i: (i, 0)),  # obs tile
                    resident((input_dims, fc1_p)),                     # w1
                    resident((1, fc1_p)),                              # b1
                    resident((fc1_p, fc2_p)),                          # w2
                    resident((1, fc2_p)),                              # b2
                    resident((fc2_p, h_pad)),                          # w_head
                    resident((1, h_pad)),                              # b_head
                ],
                out_specs=pl.BlockSpec((tb, h_pad), lambda i: (i, 0)),
            ),
            compiler_params=pltpu.CompilerParams(
                dimension_semantics=("parallel",),
                vmem_limit_bytes=vmem_budget,
            ),
            cost_estimate=cost,
        )(obs_bf16, packed["w1"], packed["b1"], packed["w2"], packed["b2"],
          packed["w_head"], packed["b_head"])

    try:
        out = call(single_buffer_weights=True)
    except Exception:
        # This jax build rejects pl.Buffered(1) on resident blocks; fall back
        # to default double-buffering (identical semantics, slightly more VMEM).
        out = call(single_buffer_weights=False)

    pi = out[:batch, :n_actions].astype(jnp.float32)
    v = out[:batch, n_actions:n_actions + 1].astype(jnp.float32)
    return pi, v


# -----------------------------------------------------------------------------
# Parameter init (roughly torch nn.Linear default) and pure-JAX reference.
# -----------------------------------------------------------------------------
def init_params(key, input_dims, fc1_dims, fc2_dims, n_actions):
    ks = jax.random.split(key, 8)

    def lin(kw, kb, fan_in, fan_out):
        bound = 1.0 / jnp.sqrt(fan_in)
        w = jax.random.uniform(kw, (fan_in, fan_out), jnp.float32, -bound, bound)
        b = jax.random.uniform(kb, (1, fan_out), jnp.float32, -bound, bound)
        return w, b

    w1, b1 = lin(ks[0], ks[1], input_dims, fc1_dims)
    w2, b2 = lin(ks[2], ks[3], fc1_dims, fc2_dims)
    w_pi, b_pi = lin(ks[4], ks[5], fc2_dims, n_actions)
    w_v, b_v = lin(ks[6], ks[7], fc2_dims, 1)
    return {"w1": w1, "b1": b1, "w2": w2, "b2": b2,
            "w_pi": w_pi, "b_pi": b_pi, "w_v": w_v, "b_v": b_v}


def _reference_forward(obs, p):
    h1 = jnp.maximum(obs @ p["w1"] + p["b1"], 0.0)
    h2 = jnp.maximum(h1 @ p["w2"] + p["b2"], 0.0)
    return h2 @ p["w_pi"] + p["b_pi"], h2 @ p["w_v"] + p["b_v"]


if __name__ == "__main__":
    # Small shapes consistent with the module's forward.
    batch, input_dims, fc1_dims, fc2_dims, n_actions = 2, 8, 32, 32, 4

    key = jax.random.PRNGKey(0)
    k_obs, k_params = jax.random.split(key)

    obs = jax.random.normal(k_obs, (batch, input_dims), jnp.float32)
    params = init_params(k_params, input_dims, fc1_dims, fc2_dims, n_actions)

    # One-time packing (hoisted out of the forward), then the fused kernel.
    packed, dims = prepare_params(params)
    pi, v = jax.block_until_ready(actor_critic_forward(obs, packed, dims))

    pi_ref, v_ref = _reference_forward(obs, params)
    assert pi.shape == (batch, n_actions) and v.shape == (batch, 1)
    # bf16 matmul operands + bf16 output slab -> looser tolerance than pure f32.
    assert jnp.allclose(pi, pi_ref, atol=4e-2, rtol=4e-2)
    assert jnp.allclose(v, v_ref, atol=4e-2, rtol=4e-2)

    print("KERNEL_OK")
</pallas_src>

<mosaic_0001>
module attributes {stable_mosaic.version = 11 : i64} {
  func.func @_actor_critic_kernel(%arg0: i32, %arg1: memref<8x8xbf16, #tpu.memory_space<vmem>>, %arg2: memref<8x128xbf16, #tpu.memory_space<vmem>>, %arg3: memref<1x128xf32, #tpu.memory_space<vmem>>, %arg4: memref<128x128xbf16, #tpu.memory_space<vmem>>, %arg5: memref<1x128xf32, #tpu.memory_space<vmem>>, %arg6: memref<128x128xbf16, #tpu.memory_space<vmem>>, %arg7: memref<1x128xf32, #tpu.memory_space<vmem>>, %arg8: memref<8x128xbf16, #tpu.memory_space<vmem>>) attributes {dimension_semantics = [#tpu.dimension_semantics<parallel>], iteration_bounds = array<i64: 1>, scalar_prefetch = 0 : i64, scratch_operands = 0 : i64, tpu.core_type = #tpu.core_type<tc>, window_params = [{transform_indices = @transform_0, window_bounds = array<i64: 8, 8>}, {pipeline_mode = #tpu.pipeline_mode<synchronous>, transform_indices = @transform_1, window_bounds = array<i64: 8, 128>}, {pipeline_mode = #tpu.pipeline_mode<synchronous>, transform_indices = @transform_2, window_bounds = array<i64: 1, 128>}, {pipeline_mode = #tpu.pipeline_mode<synchronous>, transform_indices = @transform_3, window_bounds = array<i64: 128, 128>}, {pipeline_mode = #tpu.pipeline_mode<synchronous>, transform_indices = @transform_4, window_bounds = array<i64: 1, 128>}, {pipeline_mode = #tpu.pipeline_mode<synchronous>, transform_indices = @transform_5, window_bounds = array<i64: 128, 128>}, {pipeline_mode = #tpu.pipeline_mode<synchronous>, transform_indices = @transform_6, window_bounds = array<i64: 1, 128>}, {transform_indices = @transform_7, window_bounds = array<i64: 8, 128>}]} {
    %c0 = arith.constant 0 : index
    %c0_0 = arith.constant 0 : index
    %0 = vector.load %arg1[%c0, %c0_0] : memref<8x8xbf16, #tpu.memory_space<vmem>>, vector<8x8xbf16>
    %c0_1 = arith.constant 0 : index
    %c0_2 = arith.constant 0 : index
    %1 = vector.load %arg2[%c0_1, %c0_2] : memref<8x128xbf16, #tpu.memory_space<vmem>>, vector<8x128xbf16>
    %cst = arith.constant dense<0.000000e+00> : vector<8x128xf32>
    %2 = tpu.matmul %0, %1, %cst {dimension_numbers = #tpu.dot_dimension_numbers<[1], [0], [0], [1], [0, 0, 1, 1], [], []>} : vector<8x8xbf16>, vector<8x128xbf16>, vector<8x128xf32> -> vector<8x128xf32>
    %c0_3 = arith.constant 0 : index
    %c0_4 = arith.constant 0 : index
    %3 = vector.load %arg3[%c0_3, %c0_4] : memref<1x128xf32, #tpu.memory_space<vmem>>, vector<1x128xf32>
    %4 = vector.broadcast %3 : vector<1x128xf32> to vector<8x128xf32>
    %5 = arith.addf %2, %4 : vector<8x128xf32>
    %cst_5 = arith.constant 0.000000e+00 : f32
    %6 = vector.broadcast %cst_5 : f32 to vector<8x128xf32>
    %7 = arith.maximumf %5, %6 : vector<8x128xf32>
    %8 = arith.truncf %7 : vector<8x128xf32> to vector<8x128xbf16>
    %c0_6 = arith.constant 0 : index
    %c0_7 = arith.constant 0 : index
    %9 = vector.load %arg4[%c0_6, %c0_7] : memref<128x128xbf16, #tpu.memory_space<vmem>>, vector<128x128xbf16>
    %cst_8 = arith.constant dense<0.000000e+00> : vector<8x128xf32>
    %10 = tpu.matmul %8, %9, %cst_8 {dimension_numbers = #tpu.dot_dimension_numbers<[1], [0], [0], [1], [0, 0, 1, 1], [], []>} : vector<8x128xbf16>, vector<128x128xbf16>, vector<8x128xf32> -> vector<8x128xf32>
    %c0_9 = arith.constant 0 : index
    %c0_10 = arith.constant 0 : index
    %11 = vector.load %arg5[%c0_9, %c0_10] : memref<1x128xf32, #tpu.memory_space<vmem>>, vector<1x128xf32>
    %12 = vector.broadcast %11 : vector<1x128xf32> to vector<8x128xf32>
    %13 = arith.addf %10, %12 : vector<8x128xf32>
    %cst_11 = arith.constant 0.000000e+00 : f32
    %14 = vector.broadcast %cst_11 : f32 to vector<8x128xf32>
    %15 = arith.maximumf %13, %14 : vector<8x128xf32>
    %16 = arith.truncf %15 : vector<8x128xf32> to vector<8x128xbf16>
    %c0_12 = arith.constant 0 : index
    %c0_13 = arith.constant 0 : index
    %17 = vector.load %arg6[%c0_12, %c0_13] : memref<128x128xbf16, #tpu.memory_space<vmem>>, vector<128x128xbf16>
    %cst_14 = arith.constant dense<0.000000e+00> : vector<8x128xf32>
    %18 = tpu.matmul %16, %17, %cst_14 {dimension_numbers = #tpu.dot_dimension_numbers<[1], [0], [0], [1], [0, 0, 1, 1], [], []>} : vector<8x128xbf16>, vector<128x128xbf16>, vector<8x128xf32> -> vector<8x128xf32>
    %c0_15 = arith.constant 0 : index
    %c0_16 = arith.constant 0 : index
    %19 = vector.load %arg7[%c0_15, %c0_16] : memref<1x128xf32, #tpu.memory_space<vmem>>, vector<1x128xf32>
    %20 = vector.broadcast %19 : vector<1x128xf32> to vector<8x128xf32>
    %21 = arith.addf %18, %20 : vector<8x128xf32>
    %22 = arith.truncf %21 : vector<8x128xf32> to vector<8x128xbf16>
    %c0_17 = arith.constant 0 : index
    %c0_18 = arith.constant 0 : index
    %23 = vector.load %arg8[%c0_17, %c0_18] : memref<8x128xbf16, #tpu.memory_space<vmem>>, vector<8x128xbf16>
    tpu.vector_store %arg8[%c0_17, %c0_18], %22 {strides = array<i32>} : memref<8x128xbf16, #tpu.memory_space<vmem>>, vector<8x128xbf16>,
    return
  }
  func.func @transform_0(%arg0: i32) -> (i32, i32) {
    %c0_i32 = arith.constant 0 : i32
    %c0_i32_0 = arith.constant 0 : i32
    return %arg0, %c0_i32 : i32, i32
  }
  func.func @transform_1(%arg0: i32) -> (i32, i32) {
    %c0_i32 = arith.constant 0 : i32
    %c0_i32_0 = arith.constant 0 : i32
    %c0_i32_1 = arith.constant 0 : i32
    return %c0_i32, %c0_i32_0 : i32, i32
  }
  func.func @transform_2(%arg0: i32) -> (i32, i32) {
    %c0_i32 = arith.constant 0 : i32
    %c0_i32_0 = arith.constant 0 : i32
    %c0_i32_1 = arith.constant 0 : i32
    return %c0_i32, %c0_i32_0 : i32, i32
  }
  func.func @transform_3(%arg0: i32) -> (i32, i32) {
    %c0_i32 = arith.constant 0 : i32
    %c0_i32_0 = arith.constant 0 : i32
    %c0_i32_1 = arith.constant 0 : i32
    return %c0_i32, %c0_i32_0 : i32, i32
  }
  func.func @transform_4(%arg0: i32) -> (i32, i32) {
    %c0_i32 = arith.constant 0 : i32
    %c0_i32_0 = arith.constant 0 : i32
    %c0_i32_1 = arith.constant 0 : i32
    return %c0_i32, %c0_i32_0 : i32, i32
  }
  func.func @transform_5(%arg0: i32) -> (i32, i32) {
    %c0_i32 = arith.constant 0 : i32
    %c0_i32_0 = arith.constant 0 : i32
    %c0_i32_1 = arith.constant 0 : i32
    return %c0_i32, %c0_i32_0 : i32, i32
  }
  func.func @transform_6(%arg0: i32) -> (i32, i32) {
    %c0_i32 = arith.constant 0 : i32
    %c0_i32_0 = arith.constant 0 : i32
    %c0_i32_1 = arith.constant 0 : i32
    return %c0_i32, %c0_i32_0 : i32, i32
  }
  func.func @transform_7(%arg0: i32) -> (i32, i32) {
    %c0_i32 = arith.constant 0 : i32
    %c0_i32_0 = arith.constant 0 : i32
    return %arg0, %c0_i32 : i32, i32
  }
}

module attributes {stable_mosaic.version = 11 : i64} {
  func.func @_actor_critic_kernel(%arg0: i32, %arg1: memref<8x8xbf16, #tpu.memory_space<vmem>>, %arg2: memref<8x128xbf16, #tpu.memory_space<vmem>>, %arg3: memref<1x128xf32, #tpu.memory_space<vmem>>, %arg4: memref<128x128xbf16, #tpu.memory_space<vmem>>, %arg5: memref<1x128xf32, #tpu.memory_space<vmem>>, %arg6: memref<128x128xbf16, #tpu.memory_space<vmem>>, %arg7: memref<1x128xf32, #tpu.memory_space<vmem>>, %arg8: memref<8x128xbf16, #tpu.memory_space<vmem>>) attributes {dimension_semantics = [#tpu.dimension_semantics<parallel>], iteration_bounds = array<i64: 1>, scalar_prefetch = 0 : i64, scratch_operands = 0 : i64, tpu.core_type = #tpu.core_type<tc>, window_params = [{transform_indices = @transform_0, window_bounds = array<i64: 8, 8>}, {pipeline_mode = #tpu.pipeline_mode<synchronous>, transform_indices = @transform_1, window_bounds = array<i64: 8, 128>}, {pipeline_mode = #tpu.pipeline_mode<synchronous>, transform_indices = @transform_2, window_bounds = array<i64: 1, 128>}, {pipeline_mode = #tpu.pipeline_mode<synchronous>, transform_indices = @transform_3, window_bounds = array<i64: 128, 128>}, {pipeline_mode = #tpu.pipeline_mode<synchronous>, transform_indices = @transform_4, window_bounds = array<i64: 1, 128>}, {pipeline_mode = #tpu.pipeline_mode<synchronous>, transform_indices = @transform_5, window_bounds = array<i64: 128, 128>}, {pipeline_mode = #tpu.pipeline_mode<synchronous>, transform_indices = @transform_6, window_bounds = array<i64: 1, 128>}, {transform_indices = @transform_7, window_bounds = array<i64: 8, 128>}]} {
    %c0 = arith.constant 0 : index
    %c0_0 = arith.constant 0 : index
    %0 = vector.load %arg1[%c0, %c0_0] : memref<8x8xbf16, #tpu.memory_space<vmem>>, vector<8x8xbf16>
    %c0_1 = arith.constant 0 : index
    %c0_2 = arith.constant 0 : index
    %1 = vector.load %arg2[%c0_1, %c0_2] : memref<8x128xbf16, #tpu.memory_space<vmem>>, vector<8x128xbf16>
    %cst = arith.constant dense<0.000000e+00> : vector<8x128xf32>
    %2 = tpu.matmul %0, %1, %cst {dimension_numbers = #tpu.dot_dimension_numbers<[1], [0], [0], [1], [0, 0, 1, 1], [], []>} : vector<8x8xbf16>, vector<8x128xbf16>, vector<8x128xf32> -> vector<8x128xf32>
    %c0_3 = arith.constant 0 : index
    %c0_4 = arith.constant 0 : index
    %3 = vector.load %arg3[%c0_3, %c0_4] : memref<1x128xf32, #tpu.memory_space<vmem>>, vector<1x128xf32>
    %4 = vector.broadcast %3 : vector<1x128xf32> to vector<8x128xf32>
    %5 = arith.addf %2, %4 : vector<8x128xf32>
    %cst_5 = arith.constant 0.000000e+00 : f32
    %6 = vector.broadcast %cst_5 : f32 to vector<8x128xf32>
    %7 = arith.maximumf %5, %6 : vector<8x128xf32>
    %8 = arith.truncf %7 : vector<8x128xf32> to vector<8x128xbf16>
    %c0_6 = arith.constant 0 : index
    %c0_7 = arith.constant 0 : index
    %9 = vector.load %arg4[%c0_6, %c0_7] : memref<128x128xbf16, #tpu.memory_space<vmem>>, vector<128x128xbf16>
    %cst_8 = arith.constant dense<0.000000e+00> : vector<8x128xf32>
    %10 = tpu.matmul %8, %9, %cst_8 {dimension_numbers = #tpu.dot_dimension_numbers<[1], [0], [0], [1], [0, 0, 1, 1], [], []>} : vector<8x128xbf16>, vector<128x128xbf16>, vector<8x128xf32> -> vector<8x128xf32>
    %c0_9 = arith.constant 0 : index
    %c0_10 = arith.constant 0 : index
    %11 = vector.load %arg5[%c0_9, %c0_10] : memref<1x128xf32, #tpu.memory_space<vmem>>, vector<1x128xf32>
    %12 = vector.broadcast %11 : vector<1x128xf32> to vector<8x128xf32>
    %13 = arith.addf %10, %12 : vector<8x128xf32>
    %cst_11 = arith.constant 0.000000e+00 : f32
    %14 = vector.broadcast %cst_11 : f32 to vector<8x128xf32>
    %15 = arith.maximumf %13, %14 : vector<8x128xf32>
    %16 = arith.truncf %15 : vector<8x128xf32> to vector<8x128xbf16>
    %c0_12 = arith.constant 0 : index
    %c0_13 = arith.constant 0 : index
    %17 = vector.load %arg6[%c0_12, %c0_13] : memref<128x128xbf16, #tpu.memory_space<vmem>>, vector<128x128xbf16>
    %cst_14 = arith.constant dense<0.000000e+00> : vector<8x128xf32>
    %18 = tpu.matmul %16, %17, %cst_14 {dimension_numbers = #tpu.dot_dimension_numbers<[1], [0], [0], [1], [0, 0, 1, 1], [], []>} : vector<8x128xbf16>, vector<128x128xbf16>, vector<8x128xf32> -> vector<8x128xf32>
    %c0_15 = arith.constant 0 : index
    %c0_16 = arith.constant 0 : index
    %19 = vector.load %arg7[%c0_15, %c0_16] : memref<1x128xf32, #tpu.memory_space<vmem>>, vector<1x128xf32>
    %20 = vector.broadcast %19 : vector<1x128xf32> to vector<8x128xf32>
    %21 = arith.addf %18, %20 : vector<8x128xf32>
    %22 = arith.truncf %21 : vector<8x128xf32> to vector<8x128xbf16>
    %c0_17 = arith.constant 0 : index
    %c0_18 = arith.constant 0 : index
    %23 = vector.load %arg8[%c0_17, %c0_18] : memref<8x128xbf16, #tpu.memory_space<vmem>>, vector<8x128xbf16>
    tpu.vector_store %arg8[%c0_17, %c0_18], %22 {strides = array<i32>} : memref<8x128xbf16, #tpu.memory_space<vmem>>, vector<8x128xbf16>,
    return
  }
  func.func @transform_0(%arg0: i32) -> (i32, i32) {
    %c0_i32 = arith.constant 0 : i32
    %c0_i32_0 = arith.constant 0 : i32
    return %arg0, %c0_i32 : i32, i32
  }
  func.func @transform_1(%arg0: i32) -> (i32, i32) {
    %c0_i32 = arith.constant 0 : i32
    %c0_i32_0 = arith.constant 0 : i32
    %c0_i32_1 = arith.constant 0 : i32
    return %c0_i32, %c0_i32_0 : i32, i32
  }
  func.func @transform_2(%arg0: i32) -> (i32, i32) {
    %c0_i32 = arith.constant 0 : i32
    %c0_i32_0 = arith.constant 0 : i32
    %c0_i32_1 = arith.constant 0 : i32
    return %c0_i32, %c0_i32_0 : i32, i32
  }
  func.func @transform_3(%arg0: i32) -> (i32, i32) {
    %c0_i32 = arith.constant 0 : i32
    %c0_i32_0 = arith.constant 0 : i32
    %c0_i32_1 = arith.constant 0 : i32
    return %c0_i32, %c0_i32_0 : i32, i32
  }
  func.func @transform_4(%arg0: i32) -> (i32, i32) {
    %c0_i32 = arith.constant 0 : i32
    %c0_i32_0 = arith.constant 0 : i32
    %c0_i32_1 = arith.constant 0 : i32
    return %c0_i32, %c0_i32_0 : i32, i32
  }
  func.func @transform_5(%arg0: i32) -> (i32, i32) {
    %c0_i32 = arith.constant 0 : i32
    %c0_i32_0 = arith.constant 0 : i32
    %c0_i32_1 = arith.constant 0 : i32
    return %c0_i32, %c0_i32_0 : i32, i32
  }
  func.func @transform_6(%arg0: i32) -> (i32, i32) {
    %c0_i32 = arith.constant 0 : i32
    %c0_i32_0 = arith.constant 0 : i32
    %c0_i32_1 = arith.constant 0 : i32
    return %c0_i32, %c0_i32_0 : i32, i32
  }
  func.func @transform_7(%arg0: i32) -> (i32, i32) {
    %c0_i32 = arith.constant 0 : i32
    %c0_i32_0 = arith.constant 0 : i32
    return %arg0, %c0_i32 : i32, i32
  }
}

</mosaic_0001>

<bundles_post_ra>
// kernel: tpu_custom_call.1
= control target key start
LH: loop header
LB: loop body
LE: loop exit
PB: predicated region body
PF: predicated region fallthrough
CT: control target
= control target key end

     0   :  { %12 = vsyncpa [#allocation3], 0  ;;  %s751_s0 = inlined_call_operand.hbm [shape: bf16[8,8], index: 0, kind: input, shape index: {}]   ;;  %s752_s1 = inlined_call_operand.hbm [shape: bf16[8,128], index: 1, kind: input, shape index: {}]   ;;  %s753_s2 = inlined_call_operand.vmem [shape: f32[1,128], index: 2, kind: input, shape index: {}]   ;;  %s754_s3 = inlined_call_operand.hbm [shape: bf16[128,128], index: 3, kind: input, shape index: {}]   ;;  %s755_s4 = inlined_call_operand.vmem [shape: f32[1,128], index: 4, kind: input, shape index: {}]   ;;  %s756_s5 = inlined_call_operand.hbm [shape: bf16[128,128], index: 5, kind: input, shape index: {}]   ;;  %s757_s6 = inlined_call_operand.vmem [shape: f32[1,128], index: 6, kind: input, shape index: {}]   ;;  %s758_s7 = inlined_call_operand.hbm [shape: bf16[8,128], index: 7, kind: output, shape index: {}]  }
   0x1   :  { %13 = vsyncpa [#allocation6], 0 }
   0x2   :  { %14 = vsyncpa [#allocation9], 0 }
   0x3   :  { %15 = vsyncpa [#allocation4], 0  ;;  %s610_s24 = smov [#allocation5]   ;;  %s611_s26 = smov [#allocation2]  }
   0x4   :  { %s32_s25 = sshll.u32 %s610_s24, 4  ;;  %s22_s27 = sshll.u32 %s611_s26, 4  ;;  %s33_s25 = int_to_ptr.vmem [resolvable:$true] %s32_s25  ;;  %s23_s27 = int_to_ptr.vmem [resolvable:$true] %s22_s27 }
   0x5   :  { %s492_s30 = scalar_lea.hbm %s752_s1, 64 }
   0x6   :  { %p493_p0 = scmp.ne.s32.totalorder %s752_s1, %s492_s30  ;;  %p496_p1 = scmp.lt.u32.totalorder %s492_s30, %s752_s1 }
   0x8   :  { %p498_p2 = pnand %p496_p1, %p493_p0 }
   0xa   :  { %501 = shalt.err (!%p498_p2)
}
   0xb   :  { %s502_s12 = scalar_lea.vmem %s33_s25, 64  ;;  %p507_p4 = scmp.lt.s32.totalorder %s33_s25, %s33_s25 }
   0xc   :  { %p503_p3 = scmp.ne.s32.totalorder %s33_s25, %s502_s12  ;;  %p508_p5 = scmp.lt.s32.totalorder %s502_s12, %s502_s12 }
   0xe   :  { %p509_p6 = por %p508_p5, %p507_p4 }
  0x10   :  { %p510_p7 = pnand %p509_p6, %p503_p3 }
  0x12   :  { %513 = shalt.err (!%p510_p7)
}
  0x13   :  { %35 = dma.hbm_to_vmem [thread:$0]  %s752_s1, 64, %s33_s25, [#allocation6]  }
  0x14   :  { %s514_s17 = scalar_lea.hbm %s751_s0, 64 }
  0x15   :  { %p515_p8 = scmp.ne.s32.totalorder %s751_s0, %s514_s17  ;;  %p518_p9 = scmp.lt.u32.totalorder %s514_s17, %s751_s0 }
  0x17   :  { %p520_p10 = pnand %p518_p9, %p515_p8 }
  0x19   :  { %523 = shalt.err (!%p520_p10)
}
  0x1a   :  { %s524_s22 = scalar_lea.vmem %s23_s27, 64  ;;  %p529_p12 = scmp.lt.s32.totalorder %s23_s27, %s23_s27 }
  0x1b   :  { %p525_p11 = scmp.ne.s32.totalorder %s23_s27, %s524_s22  ;;  %p530_p13 = scmp.lt.s32.totalorder %s524_s22, %s524_s22 }
  0x1d   :  { %p531_p0 = por %p530_p13, %p529_p12 }
  0x1f   :  { %p532_p1 = pnand %p531_p0, %p525_p11 }
  0x21   :  { %535 = shalt.err (!%p532_p1)
}
  0x22   :  { %25 = dma.hbm_to_vmem [thread:$0]  %s751_s0, 64, %s23_s27, [#allocation3]  }
  0x23   :  { %s612_s24 = smov [#allocation7]   ;;  %s536_s29 = scalar_lea.hbm %s754_s3, 1024 }
  0x24   :  { %s43_s25 = sshll.u32 %s612_s24, 4  ;;  %p537_p2 = scmp.ne.s32.totalorder %s754_s3, %s536_s29  ;;  %s44_s25 = int_to_ptr.vmem [resolvable:$true] %s43_s25 }
  0x25   :  { %p540_p3 = scmp.lt.u32.totalorder %s536_s29, %s754_s3 }
  0x27   :  { %p542_p4 = pnand %p540_p3, %p537_p2 }
  0x29   :  { %545 = shalt.err (!%p542_p4)
}
  0x2a   :  { %s546_s11 = scalar_lea.vmem %s44_s25, 1024  ;;  %p551_p6 = scmp.lt.s32.totalorder %s44_s25, %s44_s25 }
  0x2b   :  { %p547_p5 = scmp.ne.s32.totalorder %s44_s25, %s546_s11  ;;  %p552_p7 = scmp.lt.s32.totalorder %s546_s11, %s546_s11 }
  0x2d   :  { %p553_p8 = por %p552_p7, %p551_p6 }
  0x2f   :  { %p554_p9 = pnand %p553_p8, %p547_p5 }
  0x31   :  { %557 = shalt.err (!%p554_p9)
}
  0x32   :  { %s613_s0 = smov 64   ;;  %s614_s27 = smov 4  }
  0x33   :  { %49 = dma.hbm_to_vmem [thread:$0]  %s754_s3, 1024, %s44_s25, [#allocation6], %s613_s0, %s613_s0, %s614_s27  }
  0x34   :  { %s615_s14 = smov [#allocation8]   ;;  %s558_s18 = scalar_lea.hbm %s756_s5, 1024 }
  0x35   :  { %s57_s15 = sshll.u32 %s615_s14, 4  ;;  %p559_p10 = scmp.ne.s32.totalorder %s756_s5, %s558_s18  ;;  %s58_s15 = int_to_ptr.vmem [resolvable:$true] %s57_s15 }
  0x36   :  { %p562_p11 = scmp.lt.u32.totalorder %s558_s18, %s756_s5 }
  0x38   :  { %p564_p12 = pnand %p562_p11, %p559_p10 }
  0x3a   :  { %567 = shalt.err (!%p564_p12)
}
  0x3b   :  { %s568_s1 = scalar_lea.vmem %s58_s15, 1024  ;;  %p573_p0 = scmp.lt.s32.totalorder %s58_s15, %s58_s15 }
  0x3c   :  { %p569_p13 = scmp.ne.s32.totalorder %s58_s15, %s568_s1  ;;  %p574_p1 = scmp.lt.s32.totalorder %s568_s1, %s568_s1 }
  0x3e   :  { %p575_p2 = por %p574_p1, %p573_p0 }
  0x40   :  { %p576_p3 = pnand %p575_p2, %p569_p13 }
  0x42   :  { %579 = shalt.err (!%p576_p3)
}
  0x43   :  { %63 = dma.hbm_to_vmem [thread:$0]  %s756_s5, 1024, %s58_s15, [#allocation9], %s613_s0, %s613_s0, %s614_s27  }
  0x44   :  { %602 = dma.done.wait [#allocation3], 64  }
  0x45   :  { %603 = vsyncadd [#allocation3], 4294967232 }
  0x46   :  { %604 = dma.done.wait [#allocation6], 1088  }
  0x47   :  { %605 = vsyncadd [#allocation6], 4294966208 }
  0x48   :  { %606 = dma.done.wait [#allocation9], 1024  }
  0x49   :  { %607 = vsyncadd [#allocation9], 4294966272  ;;  %v616_v0 = vmov 0.0   ;;  %vm617_vm0 = vmmov 0   ;;  %vm92_vm1 = vcmask 1043456   ;;  %vm88_vm2 = vcmask 64512  }
  0x4a   :  { %421 = vmatprep.subr.bf16.mxu0 %v616_v0  ;;  %423 = vmatprep.mubr.msk.bf16.mxu0 %vm617_vm0, %v616_v0  ;;  %v80_v1 = vld [vmem:[#allocation5] sm:$0xf]  ;;  %v476_v3 = vld [vmem:[#allocation7] sm:$0xff]   ;;  %v79_v4 = vld [vmem:[#allocation2] sm:$0xf]  ;;  %s618_s29 = smov [#allocation10]  }
  0x4b   :  { %427 = vmatprep.subr.bf16.mxu1 %v616_v0  ;;  %443 = vmatprep.mubr.msk.bf16.mxu1 %vm617_vm0, %v616_v0  ;;  %v94_v2 = vsel %vm92_vm1, %v80_v1, 0  ;;  %v477_v5 = vld [vmem:[#allocation7 + $0x8] sm:$0xff]   ;;  %v478_v6 = vld [vmem:[#allocation7 + $0x10] sm:$0xff]   ;;  %v479_v7 = vld [vmem:[#allocation7 + $0x18] sm:$0xff]   ;;  %s370_s30 = sshll.u32 %s618_s29, 4  ;;  %s371_s30 = int_to_ptr.vmem [resolvable:$true] %s370_s30 }
  0x4c   :  { %422 = vmatpush3.bf16.msra.mxu0 %v94_v2  ;;  %428 = vmatpush3.bf16.msra.mxu1 %v476_v3  ;;  %v480_v8 = vld [vmem:[#allocation7 + $0x20] sm:$0xff]   ;;  %v481_v9 = vld [vmem:[#allocation7 + $0x28] sm:$0xff]   ;;  %v482_v10 = vld [vmem:[#allocation7 + $0x30] sm:$0xff]   ;;  %p585_p5 = scmp.lt.s32.totalorder %s371_s30, %s371_s30 }
  0x4d   :  { %447 = vmatprep.subr.bf16.mxu0 %v616_v0  ;;  %429 = vmatprep.subr.bf16.mxu1 %v616_v0  ;;  %v483_v11 = vld [vmem:[#allocation7 + $0x38] sm:$0xff]   ;;  %v484_v12 = vld [vmem:[#allocation8] sm:$0xff]   ;;  %v485_v13 = vld [vmem:[#allocation8 + $0x8] sm:$0xff]  }
  0x4e   :  { %v486_v14 = vld [vmem:[#allocation8 + $0x10] sm:$0xff]   ;;  %v487_v15 = vld [vmem:[#allocation8 + $0x18] sm:$0xff]   ;;  %v488_v16 = vld [vmem:[#allocation8 + $0x20] sm:$0xff]  }
  0x4f   :  { %424 = vmatmul.mubr.msk.bf16.vlgmr.msra.gmra.mrb[0].mxu0 %vm88_vm2, %v79_v4  ;;  %v489_v17 = vld [vmem:[#allocation8 + $0x28] sm:$0xff]   ;;  %v381_v18 = vld [vmem:[%s753_s2] ss:$0 sm:$0xff]  ;;  %v490_v26 = vld [vmem:[#allocation8 + $0x30] sm:$0xff]  }
  0x50   :  { %463 = vmatprep.mubr.msk.bf16.mxu0 %vm617_vm0, %v616_v0  ;;  %430 = vmatpush3.bf16.msra.mxu1 %v477_v5  ;;  %v491_v27 = vld [vmem:[#allocation8 + $0x38] sm:$0xff]  }
  0x51   :  { %431 = vmatprep.subr.bf16.mxu1 %v616_v0  ;;  %448 = vmatpush3.bf16.msra.mxu0 %v484_v12  ;;  %v383_v28 = vld [vmem:[%s755_s4] ss:$0 sm:$0xff]  ;;  %s580_s4 = scalar_lea.vmem %s371_s30, 64 }
  0x52   :  { %449 = vmatprep.subr.bf16.mxu0 %v616_v0  ;;  %v392_v36 = vld [vmem:[%s757_s6] ss:$0 sm:$0xff]  ;;  %p581_p4 = scmp.ne.s32.totalorder %s371_s30, %s580_s4  ;;  %p586_p6 = scmp.lt.s32.totalorder %s580_s4, %s580_s4 }
  0x54   :  { %432 = vmatpush3.bf16.msra.mxu1 %v478_v6  ;;  %p587_p7 = por %p586_p6, %p585_p5 }
  0x55   :  { %433 = vmatprep.subr.bf16.mxu1 %v616_v0  ;;  %450 = vmatpush3.bf16.msra.mxu0 %v485_v13 }
  0x56   :  { %451 = vmatprep.subr.bf16.mxu0 %v616_v0  ;;  %p588_p8 = pnand %p587_p7, %p581_p4 }
  0x58   :  { %434 = vmatpush3.bf16.msra.mxu1 %v479_v7 }
  0x59   :  { %435 = vmatprep.subr.bf16.mxu1 %v616_v0  ;;  %452 = vmatpush3.bf16.msra.mxu0 %v486_v14 }
  0x5a   :  { %453 = vmatprep.subr.bf16.mxu0 %v616_v0 }
  0x5c   :  { %436 = vmatpush3.bf16.msra.mxu1 %v480_v8 }
  0x5d   :  { %437 = vmatprep.subr.bf16.mxu1 %v616_v0  ;;  %454 = vmatpush3.bf16.msra.mxu0 %v487_v15 }
  0x5e   :  { %455 = vmatprep.subr.bf16.mxu0 %v616_v0 }
  0x60   :  { %438 = vmatpush3.bf16.msra.mxu1 %v481_v9 }
  0x61   :  { %439 = vmatprep.subr.bf16.mxu1 %v616_v0  ;;  %456 = vmatpush3.bf16.msra.mxu0 %v488_v16 }
  0x62   :  { %457 = vmatprep.subr.bf16.mxu0 %v616_v0 }
  0x64   :  { %440 = vmatpush3.bf16.msra.mxu1 %v482_v10 }
  0x65   :  { %441 = vmatprep.subr.bf16.mxu1 %v616_v0  ;;  %458 = vmatpush3.bf16.msra.mxu0 %v489_v17 }
  0x66   :  { %459 = vmatprep.subr.bf16.mxu0 %v616_v0 }
  0x68   :  { %442 = vmatpush3.bf16.msra.mxu1 %v483_v11 }
  0x69   :  { %460 = vmatpush3.bf16.msra.mxu0 %v490_v26 }
  0x6a   :  { %461 = vmatprep.subr.bf16.mxu0 %v616_v0 }
  0x6d   :  { %462 = vmatpush3.bf16.msra.mxu0 %v491_v27 }
 0x122   :  { %v130_v19 = vpop.f32.mrb[0].mxu0 }
 0x123   :  { %v131_v20 = vadd.f32 %v381_v18, %v130_v19  ;;  %v425_v21 = vpop.f32.mrb[1].mxu0 }
 0x124   :  { %v133_v22 = vpop.f32.mrb[2].mxu0 }
 0x125   :  { %v136_v23 = vmax.f32 %v131_v20, 0.0  ;;  %v426_v24 = vpop.f32.mrb[3].mxu0 }
 0x127   :  { %v137_v25 = vpack.c.bf16 %v136_v23, %v136_v23 }
 0x129   :  { %444 = vmatmul.mubr.bf16.vlgmr.msra.gmra.mrb[0].mxu1 %v137_v25 }
 0x1fc   :  { %v243_v29 = vpop.f32.mrb[0].mxu1 }
 0x1fd   :  { %v244_v30 = vadd.f32 %v383_v28, %v243_v29  ;;  %v445_v31 = vpop.f32.mrb[1].mxu1 }
 0x1fe   :  { %v246_v32 = vpop.f32.mrb[2].mxu1 }
 0x1ff   :  { %v249_v33 = vmax.f32 %v244_v30, 0.0  ;;  %v446_v34 = vpop.f32.mrb[3].mxu1 }
 0x201   :  { %v250_v35 = vpack.c.bf16 %v249_v33, %v249_v33 }
 0x203   :  { %464 = vmatmul.mubr.bf16.vlgmr.msra.gmra.mrb[4].mxu0 %v250_v35 }
 0x2d6   :  { %v356_v37 = vpop.f32.mrb[4].mxu0 }
 0x2d7   :  { %v357_v38 = vadd.f32 %v392_v36, %v356_v37  ;;  %v465_v39 = vpop.f32.mrb[5].mxu0 }
 0x2d8   :  { %v359_v40 = vpop.f32.mrb[6].mxu0 }
 0x2d9   :  { %v362_v41 = vpack.c.bf16 %v357_v38, %v357_v38  ;;  %v466_v42 = vpop.f32.mrb[7].mxu0 }
 0x2db   :  { %363 = vst [vmem:[#allocation10] sm:$0xf] %v362_v41 }
 0x2dc   :  { %591 = shalt.err (!%p588_p8)
}
 0x2dd   :  { %s592_s6 = scalar_lea.hbm %s758_s7, 64 }
 0x2de   :  { %p593_p9 = scmp.ne.s32.totalorder %s758_s7, %s592_s6  ;;  %p596_p10 = scmp.lt.u32.totalorder %s592_s6, %s758_s7 }
 0x2e0   :  { %p598_p11 = pnand %p596_p10, %p593_p9 }
 0x2e2   :  { %601 = shalt.err (!%p598_p11)
}
 0x2e3   :  { %373 = dma.vmem_to_hbm [thread:$0]  %s371_s30, 64, %s758_s7, [#allocation4]  }
 0x2e4   :  { %608 = dma.done.wait [#allocation4], 64  }
 0x2e5   :  { %609 = vsyncadd [#allocation4], 4294967232 }
 0x2e6   :  { %377 = vsyncpa [#allocation3], 1 }
 0x2e7   :  { %378 = vsyncpa [#allocation6], 1 }
 0x2e8   :  { %379 = vsyncpa [#allocation9], 1 }
 0x2e9   :  { %380 = vsyncpa [#allocation4], 1 }

// kernel: tpu_custom_call.1
= control target key start
LH: loop header
LB: loop body
LE: loop exit
PB: predicated region body
PF: predicated region fallthrough
CT: control target
= control target key end

     0   :  { %12 = vsyncpa [#allocation3], 0  ;;  %s751_s0 = inlined_call_operand.hbm [shape: bf16[8,8], index: 0, kind: input, shape index: {}]   ;;  %s752_s1 = inlined_call_operand.hbm [shape: bf16[8,128], index: 1, kind: input, shape index: {}]   ;;  %s753_s2 = inlined_call_operand.vmem [shape: f32[1,128], index: 2, kind: input, shape index: {}]   ;;  %s754_s3 = inlined_call_operand.hbm [shape: bf16[128,128], index: 3, kind: input, shape index: {}]   ;;  %s755_s4 = inlined_call_operand.vmem [shape: f32[1,128], index: 4, kind: input, shape index: {}]   ;;  %s756_s5 = inlined_call_operand.hbm [shape: bf16[128,128], index: 5, kind: input, shape index: {}]   ;;  %s757_s6 = inlined_call_operand.vmem [shape: f32[1,128], index: 6, kind: input, shape index: {}]   ;;  %s758_s7 = inlined_call_operand.hbm [shape: bf16[8,128], index: 7, kind: output, shape index: {}]  }
   0x1   :  { %13 = vsyncpa [#allocation6], 0 }
   0x2   :  { %14 = vsyncpa [#allocation9], 0 }
   0x3   :  { %15 = vsyncpa [#allocation4], 0  ;;  %s610_s24 = smov [#allocation5]   ;;  %s611_s26 = smov [#allocation2]  }
   0x4   :  { %s32_s25 = sshll.u32 %s610_s24, 4  ;;  %s22_s27 = sshll.u32 %s611_s26, 4  ;;  %s33_s25 = int_to_ptr.vmem [resolvable:$true] %s32_s25  ;;  %s23_s27 = int_to_ptr.vmem [resolvable:$true] %s22_s27 }
   0x5   :  { %s492_s30 = scalar_lea.hbm %s752_s1, 64 }
   0x6   :  { %p493_p0 = scmp.ne.s32.totalorder %s752_s1, %s492_s30  ;;  %p496_p1 = scmp.lt.u32.totalorder %s492_s30, %s752_s1 }
   0x8   :  { %p498_p2 = pnand %p496_p1, %p493_p0 }
   0xa   :  { %501 = shalt.err (!%p498_p2)
}
   0xb   :  { %s502_s12 = scalar_lea.vmem %s33_s25, 64  ;;  %p507_p4 = scmp.lt.s32.totalorder %s33_s25, %s33_s25 }
   0xc   :  { %p503_p3 = scmp.ne.s32.totalorder %s33_s25, %s502_s12  ;;  %p508_p5 = scmp.lt.s32.totalorder %s502_s12, %s502_s12 }
   0xe   :  { %p509_p6 = por %p508_p5, %p507_p4 }
  0x10   :  { %p510_p7 = pnand %p509_p6, %p503_p3 }
  0x12   :  { %513 = shalt.err (!%p510_p7)
}
  0x13   :  { %35 = dma.hbm_to_vmem [thread:$0]  %s752_s1, 64, %s33_s25, [#allocation6]  }
  0x14   :  { %s514_s17 = scalar_lea.hbm %s751_s0, 64 }
  0x15   :  { %p515_p8 = scmp.ne.s32.totalorder %s751_s0, %s514_s17  ;;  %p518_p9 = scmp.lt.u32.totalorder %s514_s17, %s751_s0 }
  0x17   :  { %p520_p10 = pnand %p518_p9, %p515_p8 }
  0x19   :  { %523 = shalt.err (!%p520_p10)
}
  0x1a   :  { %s524_s22 = scalar_lea.vmem %s23_s27, 64  ;;  %p529_p12 = scmp.lt.s32.totalorder %s23_s27, %s23_s27 }
  0x1b   :  { %p525_p11 = scmp.ne.s32.totalorder %s23_s27, %s524_s22  ;;  %p530_p13 = scmp.lt.s32.totalorder %s524_s22, %s524_s22 }
  0x1d   :  { %p531_p0 = por %p530_p13, %p529_p12 }
  0x1f   :  { %p532_p1 = pnand %p531_p0, %p525_p11 }
  0x21   :  { %535 = shalt.err (!%p532_p1)
}
  0x22   :  { %25 = dma.hbm_to_vmem [thread:$0]  %s751_s0, 64, %s23_s27, [#allocation3]  }
  0x23   :  { %s612_s24 = smov [#allocation7]   ;;  %s536_s29 = scalar_lea.hbm %s754_s3, 1024 }
  0x24   :  { %s43_s25 = sshll.u32 %s612_s24, 4  ;;  %p537_p2 = scmp.ne.s32.totalorder %s754_s3, %s536_s29  ;;  %s44_s25 = int_to_ptr.vmem [resolvable:$true] %s43_s25 }
  0x25   :  { %p540_p3 = scmp.lt.u32.totalorder %s536_s29, %s754_s3 }
  0x27   :  { %p542_p4 = pnand %p540_p3, %p537_p2 }
  0x29   :  { %545 = shalt.err (!%p542_p4)
}
  0x2a   :  { %s546_s11 = scalar_lea.vmem %s44_s25, 1024  ;;  %p551_p6 = scmp.lt.s32.totalorder %s44_s25, %s44_s25 }
  0x2b   :  { %p547_p5 = scmp.ne.s32.totalorder %s44_s25, %s546_s11  ;;  %p552_p7 = scmp.lt.s32.totalorder %s546_s11, %s546_s11 }
  0x2d   :  { %p553_p8 = por %p552_p7, %p551_p6 }
  0x2f   :  { %p554_p9 = pnand %p553_p8, %p547_p5 }
  0x31   :  { %557 = shalt.err (!%p554_p9)
}
  0x32   :  { %s613_s0 = smov 64   ;;  %s614_s27 = smov 4  }
  0x33   :  { %49 = dma.hbm_to_vmem [thread:$0]  %s754_s3, 1024, %s44_s25, [#allocation6], %s613_s0, %s613_s0, %s614_s27  }
  0x34   :  { %s615_s14 = smov [#allocation8]   ;;  %s558_s18 = scalar_lea.hbm %s756_s5, 1024 }
  0x35   :  { %s57_s15 = sshll.u32 %s615_s14, 4  ;;  %p559_p10 = scmp.ne.s32.totalorder %s756_s5, %s558_s18  ;;  %s58_s15 = int_to_ptr.vmem [resolvable:$true] %s57_s15 }
  0x36   :  { %p562_p11 = scmp.lt.u32.totalorder %s558_s18, %s756_s5 }
  0x38   :  { %p564_p12 = pnand %p562_p11, %p559_p10 }
  0x3a   :  { %567 = shalt.err (!%p564_p12)
}
  0x3b   :  { %s568_s1 = scalar_lea.vmem %s58_s15, 1024  ;;  %p573_p0 = scmp.lt.s32.totalorder %s58_s15, %s58_s15 }
  0x3c   :  { %p569_p13 = scmp.ne.s32.totalorder %s58_s15, %s568_s1  ;;  %p574_p1 = scmp.lt.s32.totalorder %s568_s1, %s568_s1 }
  0x3e   :  { %p575_p2 = por %p574_p1, %p573_p0 }
  0x40   :  { %p576_p3 = pnand %p575_p2, %p569_p13 }
  0x42   :  { %579 = shalt.err (!%p576_p3)
}
  0x43   :  { %63 = dma.hbm_to_vmem [thread:$0]  %s756_s5, 1024, %s58_s15, [#allocation9], %s613_s0, %s613_s0, %s614_s27  }
  0x44   :  { %602 = dma.done.wait [#allocation3], 64  }
  0x45   :  { %603 = vsyncadd [#allocation3], 4294967232 }
  0x46   :  { %604 = dma.done.wait [#allocation6], 1088  }
  0x47   :  { %605 = vsyncadd [#allocation6], 4294966208 }
  0x48   :  { %606 = dma.done.wait [#allocation9], 1024  }
  0x49   :  { %607 = vsyncadd [#allocation9], 4294966272  ;;  %v616_v0 = vmov 0.0   ;;  %vm617_vm0 = vmmov 0   ;;  %vm92_vm1 = vcmask 1043456   ;;  %vm88_vm2 = vcmask 64512  }
  0x4a   :  { %421 = vmatprep.subr.bf16.mxu0 %v616_v0  ;;  %423 = vmatprep.mubr.msk.bf16.mxu0 %vm617_vm0, %v616_v0  ;;  %v80_v1 = vld [vmem:[#allocation5] sm:$0xf]  ;;  %v476_v3 = vld [vmem:[#allocation7] sm:$0xff]   ;;  %v79_v4 = vld [vmem:[#allocation2] sm:$0xf]  ;;  %s618_s29 = smov [#allocation10]  }
  0x4b   :  { %427 = vmatprep.subr.bf16.mxu1 %v616_v0  ;;  %443 = vmatprep.mubr.msk.bf16.mxu1 %vm617_vm0, %v616_v0  ;;  %v94_v2 = vsel %vm92_vm1, %v80_v1, 0  ;;  %v477_v5 = vld [vmem:[#allocation7 + $0x8] sm:$0xff]   ;;  %v478_v6 = vld [vmem:[#allocation7 + $0x10] sm:$0xff]   ;;  %v479_v7 = vld [vmem:[#allocation7 + $0x18] sm:$0xff]   ;;  %s370_s30 = sshll.u32 %s618_s29, 4  ;;  %s371_s30 = int_to_ptr.vmem [resolvable:$true] %s370_s30 }
  0x4c   :  { %422 = vmatpush3.bf16.msra.mxu0 %v94_v2  ;;  %428 = vmatpush3.bf16.msra.mxu1 %v476_v3  ;;  %v480_v8 = vld [vmem:[#allocation7 + $0x20] sm:$0xff]   ;;  %v481_v9 = vld [vmem:[#allocation7 + $0x28] sm:$0xff]   ;;  %v482_v10 = vld [vmem:[#allocation7 + $0x30] sm:$0xff]   ;;  %p585_p5 = scmp.lt.s32.totalorder %s371_s30, %s371_s30 }
  0x4d   :  { %447 = vmatprep.subr.bf16.mxu0 %v616_v0  ;;  %429 = vmatprep.subr.bf16.mxu1 %v616_v0  ;;  %v483_v11 = vld [vmem:[#allocation7 + $0x38] sm:$0xff]   ;;  %v484_v12 = vld [vmem:[#allocation8] sm:$0xff]   ;;  %v485_v13 = vld [vmem:[#allocation8 + $0x8] sm:$0xff]  }
  0x4e   :  { %v486_v14 = vld [vmem:[#allocation8 + $0x10] sm:$0xff]   ;;  %v487_v15 = vld [vmem:[#allocation8 + $0x18] sm:$0xff]   ;;  %v488_v16 = vld [vmem:[#allocation8 + $0x20] sm:$0xff]  }
  0x4f   :  { %424 = vmatmul.mubr.msk.bf16.vlgmr.msra.gmra.mrb[0].mxu0 %vm88_vm2, %v79_v4  ;;  %v489_v17 = vld [vmem:[#allocation8 + $0x28] sm:$0xff]   ;;  %v381_v18 = vld [vmem:[%s753_s2] ss:$0 sm:$0xff]  ;;  %v490_v26 = vld [vmem:[#allocation8 + $0x30] sm:$0xff]  }
  0x50   :  { %463 = vmatprep.mubr.msk.bf16.mxu0 %vm617_vm0, %v616_v0  ;;  %430 = vmatpush3.bf16.msra.mxu1 %v477_v5  ;;  %v491_v27 = vld [vmem:[#allocation8 + $0x38] sm:$0xff]  }
  0x51   :  { %431 = vmatprep.subr.bf16.mxu1 %v616_v0  ;;  %448 = vmatpush3.bf16.msra.mxu0 %v484_v12  ;;  %v383_v28 = vld [vmem:[%s755_s4] ss:$0 sm:$0xff]  ;;  %s580_s4 = scalar_lea.vmem %s371_s30, 64 }
  0x52   :  { %449 = vmatprep.subr.bf16.mxu0 %v616_v0  ;;  %v392_v36 = vld [vmem:[%s757_s6] ss:$0 sm:$0xff]  ;;  %p581_p4 = scmp.ne.s32.totalorder %s371_s30, %s580_s4  ;;  %p586_p6 = scmp.lt.s32.totalorder %s580_s4, %s580_s4 }
  0x54   :  { %432 = vmatpush3.bf16.msra.mxu1 %v478_v6  ;;  %p587_p7 = por %p586_p6, %p585_p5 }
  0x55   :  { %433 = vmatprep.subr.bf16.mxu1 %v616_v0  ;;  %450 = vmatpush3.bf16.msra.mxu0 %v485_v13 }
  0x56   :  { %451 = vmatprep.subr.bf16.mxu0 %v616_v0  ;;  %p588_p8 = pnand %p587_p7, %p581_p4 }
  0x58   :  { %434 = vmatpush3.bf16.msra.mxu1 %v479_v7 }
  0x59   :  { %435 = vmatprep.subr.bf16.mxu1 %v616_v0  ;;  %452 = vmatpush3.bf16.msra.mxu0 %v486_v14 }
  0x5a   :  { %453 = vmatprep.subr.bf16.mxu0 %v616_v0 }
  0x5c   :  { %436 = vmatpush3.bf16.msra.mxu1 %v480_v8 }
  0x5d   :  { %437 = vmatprep.subr.bf16.mxu1 %v616_v0  ;;  %454 = vmatpush3.bf16.msra.mxu0 %v487_v15 }
  0x5e   :  { %455 = vmatprep.subr.bf16.mxu0 %v616_v0 }
  0x60   :  { %438 = vmatpush3.bf16.msra.mxu1 %v481_v9 }
  0x61   :  { %439 = vmatprep.subr.bf16.mxu1 %v616_v0  ;;  %456 = vmatpush3.bf16.msra.mxu0 %v488_v16 }
  0x62   :  { %457 = vmatprep.subr.bf16.mxu0 %v616_v0 }
  0x64   :  { %440 = vmatpush3.bf16.msra.mxu1 %v482_v10 }
  0x65   :  { %441 = vmatprep.subr.bf16.mxu1 %v616_v0  ;;  %458 = vmatpush3.bf16.msra.mxu0 %v489_v17 }
  0x66   :  { %459 = vmatprep.subr.bf16.mxu0 %v616_v0 }
  0x68   :  { %442 = vmatpush3.bf16.msra.mxu1 %v483_v11 }
  0x69   :  { %460 = vmatpush3.bf16.msra.mxu0 %v490_v26 }
  0x6a   :  { %461 = vmatprep.subr.bf16.mxu0 %v616_v0 }
  0x6d   :  { %462 = vmatpush3.bf16.msra.mxu0 %v491_v27 }
 0x122   :  { %v130_v19 = vpop.f32.mrb[0].mxu0 }
 0x123   :  { %v131_v20 = vadd.f32 %v381_v18, %v130_v19  ;;  %v425_v21 = vpop.f32.mrb[1].mxu0 }
 0x124   :  { %v133_v22 = vpop.f32.mrb[2].mxu0 }
 0x125   :  { %v136_v23 = vmax.f32 %v131_v20, 0.0  ;;  %v426_v24 = vpop.f32.mrb[3].mxu0 }
 0x127   :  { %v137_v25 = vpack.c.bf16 %v136_v23, %v136_v23 }
 0x129   :  { %444 = vmatmul.mubr.bf16.vlgmr.msra.gmra.mrb[0].mxu1 %v137_v25 }
 0x1fc   :  { %v243_v29 = vpop.f32.mrb[0].mxu1 }
 0x1fd   :  { %v244_v30 = vadd.f32 %v383_v28, %v243_v29  ;;  %v445_v31 = vpop.f32.mrb[1].mxu1 }
 0x1fe   :  { %v246_v32 = vpop.f32.mrb[2].mxu1 }
 0x1ff   :  { %v249_v33 = vmax.f32 %v244_v30, 0.0  ;;  %v446_v34 = vpop.f32.mrb[3].mxu1 }
 0x201   :  { %v250_v35 = vpack.c.bf16 %v249_v33, %v249_v33 }
 0x203   :  { %464 = vmatmul.mubr.bf16.vlgmr.msra.gmra.mrb[4].mxu0 %v250_v35 }
 0x2d6   :  { %v356_v37 = vpop.f32.mrb[4].mxu0 }
 0x2d7   :  { %v357_v38 = vadd.f32 %v392_v36, %v356_v37  ;;  %v465_v39 = vpop.f32.mrb[5].mxu0 }
 0x2d8   :  { %v359_v40 = vpop.f32.mrb[6].mxu0 }
 0x2d9   :  { %v362_v41 = vpack.c.bf16 %v357_v38, %v357_v38  ;;  %v466_v42 = vpop.f32.mrb[7].mxu0 }
 0x2db   :  { %363 = vst [vmem:[#allocation10] sm:$0xf] %v362_v41 }
 0x2dc   :  { %591 = shalt.err (!%p588_p8)
}
 0x2dd   :  { %s592_s6 = scalar_lea.hbm %s758_s7, 64 }
 0x2de   :  { %p593_p9 = scmp.ne.s32.totalorder %s758_s7, %s592_s6  ;;  %p596_p10 = scmp.lt.u32.totalorder %s592_s6, %s758_s7 }
 0x2e0   :  { %p598_p11 = pnand %p596_p10, %p593_p9 }
 0x2e2   :  { %601 = shalt.err (!%p598_p11)
}
 0x2e3   :  { %373 = dma.vmem_to_hbm [thread:$0]  %s371_s30, 64, %s758_s7, [#allocation4]  }
 0x2e4   :  { %608 = dma.done.wait [#allocation4], 64  }
 0x2e5   :  { %609 = vsyncadd [#allocation4], 4294967232 }
 0x2e6   :  { %377 = vsyncpa [#allocation3], 1 }
 0x2e7   :  { %378 = vsyncpa [#allocation6], 1 }
 0x2e8   :  { %379 = vsyncpa [#allocation9], 1 }
 0x2e9   :  { %380 = vsyncpa [#allocation4], 1 }

</bundles_post_ra>
